<compile_context>
chip_gen: v7x
topology: tpu7x:2x2x1
jax: 0.10.0
libtpu: 0.0.40
codegen_flags: <defaults>
</compile_context>

<pallas_src>
import numpy as np
import jax
import jax.numpy as jnp
from jax.experimental import pallas as pl
from jax.experimental.pallas import tpu as pltpu

GAMMA = 2.0   # focal loss gamma (statically 2 -> computed as q*q)
ALPHA = 1.0   # focal loss per-class weight (uniform)
EPS = 1e-10


# ----------------------------------------------------------------------------
# host-side rampup weight (pure scalars, no device work needed)
# ----------------------------------------------------------------------------
def sigmoid_rampup(current, rampup_length):
    if rampup_length == 0:
        return 1.0
    current = float(np.clip(current, 0.0, rampup_length))
    phase = 1.0 - current / rampup_length
    return float(np.exp(-5.0 * phase * phase))


def get_current_consistency_weight(epoch, consistency=1.0, consistency_rampup=40):
    return consistency * sigmoid_rampup(epoch, consistency_rampup)


# ----------------------------------------------------------------------------
# main kernel: focal(2-class) + Cox partial likelihood, lane-major layout
# ----------------------------------------------------------------------------
def _yx_loss_kernel(pred_ref, label_ref, t_row_ref, t_col_ref, cens_ref, out_ref):
    pred = pred_ref[...]        # (2, N) f32 logits, classes on sublanes
    label = label_ref[...]      # (1, N) int32, -1 = ignore
    t_row = t_row_ref[...]      # (1, N) f32  survival time T_j (lanes)
    t_col = t_col_ref[...]      # (N, 1) f32  survival time T_i (sublanes)
    cens = cens_ref[...]        # (1, N) f32  event indicator E

    # ---- closed-form 2-class softmax: P_risk = softmax(pred)[:, 0] = sigmoid(d) ----
    d = pred[0:1, :] - pred[1:2, :]                 # (1, N)
    sig_d = 1.0 / (1.0 + jnp.exp(-d))               # (1, N)

    # ---- focal cross-entropy on rows with label != -1 ----
    valid_f = (label != -1).astype(jnp.float32)     # (1, N)
    pt = jnp.where(label == 0, sig_d, 1.0 - sig_d) + EPS
    q = 1.0 - pt
    focal = -ALPHA * (q * q) * jnp.log(pt)          # gamma == 2  ->  q*q
    n_valid = jnp.sum(valid_f, axis=1, keepdims=True)               # (1, 1)
    # NOTE: deviates from PyTorch when every label is -1 (returns 0 instead of NaN).
    loss_ce = jnp.sum(focal * valid_f, axis=1, keepdims=True) / jnp.maximum(n_valid, 1.0)

    # ---- DeepSurv (Cox negative partial log-likelihood) on r = P_risk ----
    exp_r = jnp.exp(sig_d)                          # (1, N)  exp(r_j) on lanes
    at_risk = t_row >= t_col                        # (N, N)  [i, j] = T_j >= T_i
    masked = jnp.where(at_risk, exp_r, 0.0)         # row-broadcast of exp(r_j)
    risk_sum_col = jnp.sum(masked, axis=1, keepdims=True)           # (N, 1)
    log_rs = jnp.log(jnp.transpose(risk_sum_col))                   # (1, N) lane-major
    partial_ll = (sig_d - log_rs) * cens                            # (1, N)

    sum_e = jnp.sum(cens, axis=1, keepdims=True)                    # (1, 1)
    has_events = sum_e > 0.0
    loss_surv = -jnp.sum(partial_ll, axis=1, keepdims=True) / jnp.maximum(sum_e, 1.0)
    total = loss_ce + jnp.where(has_events, loss_surv, 0.0)

    # fused (1, 2) output: [loss_ce, loss_total]
    lane_idx = jax.lax.broadcasted_iota(jnp.int32, (1, 2), 1)
    out_ref[...] = jnp.where(lane_idx == 0, loss_ce, total)


# ----------------------------------------------------------------------------
# generic lane-major focal loss kernel (used for the 5-class lesion head)
# ----------------------------------------------------------------------------
def _focal_loss_kernel(logits_ref, label_ref, out_ref):
    logits = logits_ref[...]    # (C, M) f32, classes on sublanes, samples on lanes
    label = label_ref[...]      # (1, M) int32, -1 = ignore
    c, m = logits.shape

    mx = jnp.max(logits, axis=0, keepdims=True)         # (1, M)
    e = jnp.exp(logits - mx)                            # (C, M)
    denom = jnp.sum(e, axis=0, keepdims=True)           # (1, M)
    prob = e / denom                                    # (C, M)

    valid_f = (label != -1).astype(jnp.float32)         # (1, M)
    class_idx = jax.lax.broadcasted_iota(jnp.int32, (c, m), 0)
    onehot = (class_idx == label).astype(jnp.float32)   # (C, M); all-zero for label==-1
    pt = jnp.sum(onehot * prob, axis=0, keepdims=True) + EPS        # (1, M)
    qf = 1.0 - pt
    focal = -ALPHA * (qf * qf) * jnp.log(pt)            # masked rows zeroed below

    n_valid = jnp.sum(valid_f, axis=1, keepdims=True)
    out_ref[...] = (jnp.sum(focal * valid_f, axis=1, keepdims=True)
                    / jnp.maximum(n_valid, 1.0))


# ----------------------------------------------------------------------------
# wrappers
# ----------------------------------------------------------------------------
_VMEM_SPEC = pl.BlockSpec(memory_space=pltpu.MemorySpace.VMEM)


def _focal_loss(logits_mc, label_m):
    """logits_mc: (M, C) f32; label_m: (M,) int32 (-1 = ignore). Returns scalar."""
    m, c = logits_mc.shape
    out = pl.pallas_call(
        _focal_loss_kernel,
        out_shape=jax.ShapeDtypeStruct((1, 1), jnp.float32),
        in_specs=[_VMEM_SPEC, _VMEM_SPEC],
        out_specs=_VMEM_SPEC,
    )(jnp.transpose(logits_mc.astype(jnp.float32)),       # (C, M) lane-major
      label_m.astype(jnp.int32).reshape(1, m))
    return out[0, 0]


def yx_loss(pred, label, os_time, os_censor,
            lesions_pred=None, lesions_label=None, epoch=0, epochs=40):
    """Forward pass of YXLoss.

    pred:       (N, 2) f32 logits
    label:      (N,)   int   (-1 = ignore)
    os_time:    (N,)   f32   survival time
    os_censor:  (N,)   f32   event indicator
    lesions_pred / lesions_label: optional (..., 5) logits / (...) labels
    epoch / epochs: host ints for the consistency-rampup class weight
    """
    n, c = pred.shape
    assert c == 2, "YXLoss main head is a 2-class focal loss"

    pred_t = jnp.transpose(pred.astype(jnp.float32))            # (2, N) lane-major
    label_row = label.astype(jnp.int32).reshape(1, n)
    t_f32 = os_time.astype(jnp.float32)
    t_row = t_f32.reshape(1, n)
    t_col = t_f32.reshape(n, 1)
    cens_row = os_censor.astype(jnp.float32).reshape(1, n)

    out = pl.pallas_call(
        _yx_loss_kernel,
        out_shape=jax.ShapeDtypeStruct((1, 2), jnp.float32),
        in_specs=[_VMEM_SPEC] * 5,
        out_specs=_VMEM_SPEC,
    )(pred_t, label_row, t_row, t_col, cens_row)

    loss_ce = out[0, 0]
    loss_total = out[0, 1]

    # `if results['pred'].shape[0] == 1: return loss` — static shape check in JAX.
    if n == 1:
        return loss_ce

    loss = loss_total
    if lesions_pred is not None:
        cls_weight = 0.1 * (1.0 - get_current_consistency_weight(
            epoch, consistency=1.0, consistency_rampup=epochs))
        num_cls = lesions_pred.shape[-1]
        lp = lesions_pred.reshape(-1, num_cls)
        ll = lesions_label.reshape(-1)
        loss4 = _focal_loss(lp, ll)
        loss = loss + loss4 * jnp.float32(cls_weight)
    return loss


if __name__ == "__main__":
    key = jax.random.PRNGKey(0)
    k1, k2, k3, k4, k5, k6 = jax.random.split(key, 6)

    N, C = 8, 2
    pred = jax.random.normal(k1, (N, C), dtype=jnp.float32)
    # labels in {-1, 0, 1}; -1 rows are ignored by the focal loss
    label = jax.random.randint(k2, (N,), minval=-1, maxval=2, dtype=jnp.int32)
    os_time = jax.random.uniform(k3, (N,), minval=1.0, maxval=60.0, dtype=jnp.float32)
    os_censor = jax.random.bernoulli(k4, p=0.6, shape=(N,)).astype(jnp.float32)

    # lesion head: batch=2, 4 lesions per sample, 5 classes; labels in {-1, 0..4}
    lesions_pred = jax.random.normal(k5, (2, 4, 5), dtype=jnp.float32)
    lesions_label = jax.random.randint(k6, (2, 4), minval=-1, maxval=5, dtype=jnp.int32)

    loss = yx_loss(pred, label, os_time, os_censor,
                   lesions_pred=lesions_pred, lesions_label=lesions_label,
                   epoch=5, epochs=40)
    jax.block_until_ready(loss)
    print("KERNEL_OK")
</pallas_src>

<mosaic_0001>
module attributes {stable_mosaic.version = 11 : i64} {
  func.func @_yx_loss_kernel(%arg0: memref<2x8xf32, #tpu.memory_space<vmem>>, %arg1: memref<1x8xi32, #tpu.memory_space<vmem>>, %arg2: memref<1x8xf32, #tpu.memory_space<vmem>>, %arg3: memref<8x1xf32, #tpu.memory_space<vmem>>, %arg4: memref<1x8xf32, #tpu.memory_space<vmem>>, %arg5: memref<1x2xf32, #tpu.memory_space<vmem>>) attributes {dimension_semantics = [], scalar_prefetch = 0 : i64, scratch_operands = 0 : i64, tpu.core_type = #tpu.core_type<tc>} {
    %c0 = arith.constant 0 : index
    %c0_0 = arith.constant 0 : index
    %0 = vector.load %arg0[%c0, %c0_0] : memref<2x8xf32, #tpu.memory_space<vmem>>, vector<2x8xf32>
    %c0_1 = arith.constant 0 : index
    %c0_2 = arith.constant 0 : index
    %1 = vector.load %arg1[%c0_1, %c0_2] : memref<1x8xi32, #tpu.memory_space<vmem>>, vector<1x8xi32>
    %c0_3 = arith.constant 0 : index
    %c0_4 = arith.constant 0 : index
    %2 = vector.load %arg2[%c0_3, %c0_4] : memref<1x8xf32, #tpu.memory_space<vmem>>, vector<1x8xf32>
    %c0_5 = arith.constant 0 : index
    %c0_6 = arith.constant 0 : index
    %3 = vector.load %arg3[%c0_5, %c0_6] : memref<8x1xf32, #tpu.memory_space<vmem>>, vector<8x1xf32>
    %c0_7 = arith.constant 0 : index
    %c0_8 = arith.constant 0 : index
    %4 = vector.load %arg4[%c0_7, %c0_8] : memref<1x8xf32, #tpu.memory_space<vmem>>, vector<1x8xf32>
    %5 = vector.extract_strided_slice %0 {offsets = [0, 0], sizes = [1, 8], strides = [1, 1]} : vector<2x8xf32> to vector<1x8xf32>
    %6 = vector.extract_strided_slice %0 {offsets = [1, 0], sizes = [1, 8], strides = [1, 1]} : vector<2x8xf32> to vector<1x8xf32>
    %7 = arith.subf %5, %6 : vector<1x8xf32>
    %cst = arith.constant 0.000000e+00 : f32
    %8 = vector.broadcast %cst : f32 to vector<1x8xf32>
    %9 = arith.subf %8, %7 : vector<1x8xf32>
    %10 = math.exp %9 : vector<1x8xf32>
    %cst_9 = arith.constant 1.000000e+00 : f32
    %11 = vector.broadcast %cst_9 : f32 to vector<1x8xf32>
    %12 = arith.addf %11, %10 : vector<1x8xf32>
    %cst_10 = arith.constant 1.000000e+00 : f32
    %13 = vector.broadcast %cst_10 : f32 to vector<1x8xf32>
    %14 = arith.divf %13, %12 : vector<1x8xf32>
    %c-1_i32 = arith.constant -1 : i32
    %15 = vector.broadcast %c-1_i32 : i32 to vector<1x8xi32>
    %16 = arith.cmpi ne, %1, %15 : vector<1x8xi32>
    %17 = arith.extui %16 : vector<1x8xi1> to vector<1x8xi32>
    %18 = arith.sitofp %17 : vector<1x8xi32> to vector<1x8xf32>
    %c0_i32 = arith.constant 0 : i32
    %19 = vector.broadcast %c0_i32 : i32 to vector<1x8xi32>
    %20 = arith.cmpi eq, %1, %19 : vector<1x8xi32>
    %cst_11 = arith.constant 1.000000e+00 : f32
    %21 = vector.broadcast %cst_11 : f32 to vector<1x8xf32>
    %22 = arith.subf %21, %14 : vector<1x8xf32>
    %23 = arith.select %20, %14, %22 : vector<1x8xi1>, vector<1x8xf32>
    %cst_12 = arith.constant 1.000000e-10 : f32
    %24 = vector.broadcast %cst_12 : f32 to vector<1x8xf32>
    %25 = arith.addf %23, %24 : vector<1x8xf32>
    %cst_13 = arith.constant 1.000000e+00 : f32
    %26 = vector.broadcast %cst_13 : f32 to vector<1x8xf32>
    %27 = arith.subf %26, %25 : vector<1x8xf32>
    %28 = arith.mulf %27, %27 : vector<1x8xf32>
    %cst_14 = arith.constant -1.000000e+00 : f32
    %29 = vector.broadcast %cst_14 : f32 to vector<1x8xf32>
    %30 = arith.mulf %29, %28 : vector<1x8xf32>
    %31 = math.log %25 : vector<1x8xf32>
    %32 = arith.mulf %30, %31 : vector<1x8xf32>
    %cst_15 = arith.constant dense<0.000000e+00> : vector<1xf32>
    %33 = vector.multi_reduction <add>, %18, %cst_15 [1] : vector<1x8xf32> to vector<1xf32>
    %34 = vector.shape_cast %33 : vector<1xf32> to vector<1x1xf32>
    %35 = arith.mulf %32, %18 : vector<1x8xf32>
    %cst_16 = arith.constant dense<0.000000e+00> : vector<1xf32>
    %36 = vector.multi_reduction <add>, %35, %cst_16 [1] : vector<1x8xf32> to vector<1xf32>
    %37 = vector.shape_cast %36 : vector<1xf32> to vector<1x1xf32>
    %cst_17 = arith.constant 1.000000e+00 : f32
    %38 = vector.broadcast %cst_17 : f32 to vector<1x1xf32>
    %39 = arith.maximumf %34, %38 : vector<1x1xf32>
    %40 = arith.divf %37, %39 : vector<1x1xf32>
    %41 = math.exp %14 : vector<1x8xf32>
    %42 = vector.broadcast %2 : vector<1x8xf32> to vector<8x8xf32>
    %43 = vector.broadcast %3 : vector<8x1xf32> to vector<8x8xf32>
    %44 = arith.cmpf oge, %42, %43 : vector<8x8xf32>
    %cst_18 = arith.constant 0.000000e+00 : f32
    %45 = vector.shape_cast %41 : vector<1x8xf32> to vector<1x8xf32>
    %46 = vector.broadcast %45 : vector<1x8xf32> to vector<8x8xf32>
    %47 = vector.broadcast %cst_18 : f32 to vector<8x8xf32>
    %48 = arith.select %44, %46, %47 : vector<8x8xi1>, vector<8x8xf32>
    %cst_19 = arith.constant dense<0.000000e+00> : vector<8xf32>
    %49 = vector.multi_reduction <add>, %48, %cst_19 [1] : vector<8x8xf32> to vector<8xf32>
    %50 = vector.shape_cast %49 : vector<8xf32> to vector<8x1xf32>
    %51 = tpu.transpose %50, [1, 0] : vector<8x1xf32> -> vector<1x8xf32>
    %52 = math.log %51 : vector<1x8xf32>
    %53 = arith.subf %14, %52 : vector<1x8xf32>
    %54 = arith.mulf %53, %4 : vector<1x8xf32>
    %cst_20 = arith.constant dense<0.000000e+00> : vector<1xf32>
    %55 = vector.multi_reduction <add>, %4, %cst_20 [1] : vector<1x8xf32> to vector<1xf32>
    %56 = vector.shape_cast %55 : vector<1xf32> to vector<1x1xf32>
    %cst_21 = arith.constant 0.000000e+00 : f32
    %57 = vector.broadcast %cst_21 : f32 to vector<1x1xf32>
    %58 = arith.cmpf ogt, %56, %57 : vector<1x1xf32>
    %cst_22 = arith.constant dense<0.000000e+00> : vector<1xf32>
    %59 = vector.multi_reduction <add>, %54, %cst_22 [1] : vector<1x8xf32> to vector<1xf32>
    %60 = vector.shape_cast %59 : vector<1xf32> to vector<1x1xf32>
    %cst_23 = arith.constant 0.000000e+00 : f32
    %61 = vector.broadcast %cst_23 : f32 to vector<1x1xf32>
    %62 = arith.subf %61, %60 : vector<1x1xf32>
    %cst_24 = arith.constant 1.000000e+00 : f32
    %63 = vector.broadcast %cst_24 : f32 to vector<1x1xf32>
    %64 = arith.maximumf %56, %63 : vector<1x1xf32>
    %65 = arith.divf %62, %64 : vector<1x1xf32>
    %cst_25 = arith.constant 0.000000e+00 : f32
    %66 = vector.broadcast %cst_25 : f32 to vector<1x1xf32>
    %67 = arith.select %58, %65, %66 : vector<1x1xi1>, vector<1x1xf32>
    %68 = arith.addf %40, %67 : vector<1x1xf32>
    %69 = tpu.iota {dimensions = array<i32: 1>} : vector<1x2xi32>
    %c0_i32_26 = arith.constant 0 : i32
    %70 = vector.broadcast %c0_i32_26 : i32 to vector<1x2xi32>
    %71 = arith.cmpi eq, %69, %70 : vector<1x2xi32>
    %72 = vector.shape_cast %40 : vector<1x1xf32> to vector<1x1xf32>
    %73 = vector.broadcast %72 : vector<1x1xf32> to vector<1x2xf32>
    %74 = vector.shape_cast %68 : vector<1x1xf32> to vector<1x1xf32>
    %75 = vector.broadcast %74 : vector<1x1xf32> to vector<1x2xf32>
    %76 = arith.select %71, %73, %75 : vector<1x2xi1>, vector<1x2xf32>
    %c0_27 = arith.constant 0 : index
    %c0_28 = arith.constant 0 : index
    %77 = vector.load %arg5[%c0_27, %c0_28] : memref<1x2xf32, #tpu.memory_space<vmem>>, vector<1x2xf32>
    tpu.vector_store %arg5[%c0_27, %c0_28], %76 {strides = array<i32>} : memref<1x2xf32, #tpu.memory_space<vmem>>, vector<1x2xf32>,
    return
  }
}

</mosaic_0001>

<bundles_post_ra>
// kernel: tpu_custom_call.1
= control target key start
LH: loop header
LB: loop body
LE: loop exit
PB: predicated region body
PF: predicated region fallthrough
CT: control target
= control target key end

     0   :  { %s260_s0 = inlined_call_operand.vmem [shape: f32[2,8], index: 0, kind: input, shape index: {}]   ;;  %s261_s1 = inlined_call_operand.vmem [shape: s32[1,8], index: 1, kind: input, shape index: {}]   ;;  %s262_s2 = inlined_call_operand.vmem [shape: f32[1,8], index: 2, kind: input, shape index: {}]   ;;  %s263_s3 = inlined_call_operand.vmem [shape: f32[8,1], index: 3, kind: input, shape index: {}]   ;;  %s264_s4 = inlined_call_operand.vmem [shape: f32[1,8], index: 4, kind: input, shape index: {}]   ;;  %s265_s5 = inlined_call_operand.hbm [shape: f32[1,2], index: 5, kind: output, shape index: {}]  }
   0x1   :  { %v24_v0 = vld [vmem:[%s263_s3] sm:$0xff] }
   0x2   :  { %10 = vsyncpa [#allocation3], 0  ;;  %v196_v1 = vmov 0   ;;  %v21_v2 = vld [vmem:[%s260_s0] sm:$0x3]  ;;  %v74_v11 = vlaneseq  ;;  %vm79_vm0 = vcmask 64512  }
   0x3   :  { %157 = vset.pattern.permute.xlu0 %v196_v1  ;;  %v27_v3 = vrot.slane %v21_v2, 1  ;;  %v153_v15 = vld [vmem:[%s262_s2] ss:$0 sm:$0xff]  ;;  %vm49_vm4 = vcmask 57344   ;;  %v197_v25 = vmov 0.0   ;;  %vm136_vm7 = vcmask 8192  }
   0x4   :  { %70 = vperm.xlu0 %157, %v24_v0   ;;  %v75_v12 = vshrl.u32 %v74_v11, 7  ;;  %v22_v21 = vld [vmem:[%s261_s1] sm:$0x1]  ;;  %v133_v52 = vand.u32 127, %v74_v11 }
   0x5   :  { %v29_v4 = vsub.f32 %v21_v2, %v27_v3  ;;  %vm39_vm2 = vcmp.eq.s32.totalorder %v22_v21, 0  ;;  %vm36_vm3 = vcmp.ne.s32.totalorder %v22_v21, 4294967295  ;;  %v25_v35 = vld [vmem:[%s264_s4] sm:$0x1]  ;;  %s198_s4 = smov [#allocation2]  }
   0x6   :  { %v76_v13 = vsub.s32 0, %v75_v12  ;;  %v152_v26 = vsel %vm36_vm3, 1.0, %v197_v25  ;;  %v119_v36 = vsel %vm49_vm4, %v25_v35, 0.0  ;;  %s144_s24 = sshll.u32 %s198_s4, 4  ;;  %vm134_vm6 = vcmp.eq.s32.totalorder %v133_v52, 0  ;;  %s145_s24 = int_to_ptr.vmem [resolvable:$true] %s144_s24 }
   0x7   :  { %v30_v5 = vsub.f32 0.0, %v29_v4  ;;  %v50_v27 = vsel %vm49_vm4, %v152_v26, 0.0  ;;  %s172_s25 = scalar_lea.vmem %s145_s24, 16  ;;  %s176_s26 = scalar_lea.vmem %s145_s24, 32 }
   0x8   :  { %p173_p0 = scmp.ne.s32.totalorder %s145_s24, %s172_s25  ;;  %p177_p1 = scmp.lt.s32.totalorder %s145_s24, %s145_s24 }
   0x9   :  { %v31_v6 = vmul.f32 1.442695, %v30_v5  ;;  %p178_p2 = scmp.lt.s32.totalorder %s176_s26, %s172_s25 }
   0xb   :  { %158 = vpow2.f32 %v31_v6  ;;  %p179_p3 = por %p178_p2, %p177_p1 }
   0xd   :  { %p180_p4 = pnand %p179_p3, %p173_p0 }
  0x15   :  { %v159_v7 = vpop.eup %158 }
  0x16   :  { %v33_v8 = vadd.f32 1.0, %v159_v7 }
  0x18   :  { %160 = vrcp.f32 %v33_v8 }
  0x22   :  { %v161_v9 = vpop.eup %160 }
  0x23   :  { %v60_v10 = vmul.f32 1.442695, %v161_v9  ;;  %v40_v22 = vsub.f32 1.0, %v161_v9 }
  0x25   :  { %162 = vpow2.f32 %v60_v10  ;;  %v41_v23 = vsel %vm39_vm2, %v161_v9, %v40_v22 }
  0x26   :  { %v42_v24 = vadd.f32 1e-10, %v41_v23 }
  0x28   :  { %164 = vlog2.f32 %v42_v24  ;;  %v43_v28 = vsub.f32 1.0, %v42_v24 }
  0x2a   :  { %v44_v29 = vmul.f32 %v43_v28, %v43_v28 }
  0x2c   :  { %v45_v31 = vmul.f32 -1.0, %v44_v29 }
  0x2f   :  { %v163_v14 = vpop.eup %162 }
  0x30   :  { %v77_v16 = vrot.slane %v163_v14, %v76_v13 }
  0x32   :  { %v165_v30 = vpop.eup %164 }
  0x33   :  { %v47_v32 = vmul.f32 0.6931472, %v165_v30 }
  0x35   :  { %v48_v33 = vmul.f32 %v47_v32, %v45_v31 }
  0x37   :  { %v53_v34 = vmul.f32 %v152_v26, %v48_v33 }
  0x39   :  { %v54_v43 = vsel %vm49_vm4, %v53_v34, 0.0 }
  0x83   :  { %v71_v17 = vpop.permute.xlu0 %70 }
  0x84   :  { %vm73_vm1 = vcmp.ge.f32.partialorder %v153_v15, %v71_v17 }
  0x85   :  { %v78_v18 = vsel %vm73_vm1, %v77_v16, 0.0 }
  0x86   :  { %v80_v19 = vsel %vm79_vm0, %v78_v18, 0.0 }
  0x87   :  { %81 = vadd.xlane.f32.xlu0 %v80_v19 }
  0x8b   :  { %51 = vadd.xlane.f32.xlu0 %v50_v27 }
 0x114   :  { %v82_v20 = vpop.xlane.xlu0 %81 }
 0x115   :  { %83 = vxpose.xlu1.b32.start.end [1/1] (short) (narrow) %v82_v20, 8 }
 0x118   :  { %v52_v45 = vpop.xlane.xlu0 %51 }
 0x119   :  { %v57_v47 = vmax.f32 %v52_v45, 1.0 }
 0x13c   :  { %120 = vadd.xlane.f32.xlu1 %v119_v36 }
 0x195   :  { %v99_v37 = vpop.trf.xlu1 }
 0x196   :  { %166 = vlog2.f32 %v99_v37 }
 0x1a0   :  { %v167_v38 = vpop.eup %166 }
 0x1a1   :  { %v116_v39 = vmul.f32 0.6931472, %v167_v38 }
 0x1a3   :  { %v117_v40 = vsub.f32 %v161_v9, %v116_v39 }
 0x1a5   :  { %v118_v41 = vmul.f32 %v117_v40, %v25_v35 }
 0x1a7   :  { %v123_v42 = vsel %vm49_vm4, %v118_v41, 0.0 }
 0x1a8   :  { %124 = vadd.xlane.f32.xlu0 %v123_v42 }
 0x1ac   :  { %55 = vadd.xlane.f32.xlu0 %v54_v43 }
 0x1c9   :  { %v121_v44 = vpop.xlane.xlu1 %120 }
 0x1ca   :  { %v127_v46 = vmax.f32 %v121_v44, 1.0  ;;  %vm122_vm5 = vcmp.gt.f32.partialorder %v121_v44, 0.0 }
 0x1cc   :  { %168 = vrcp.f32 %v127_v46 }
 0x1cd   :  { %170 = vrcp.f32 %v57_v47 }
 0x1d6   :  { %v169_v48 = vpop.eup %168 }
 0x1d7   :  { %v171_v51 = vpop.eup %170 }
 0x235   :  { %v125_v49 = vpop.xlane.xlu0 %124 }
 0x236   :  { %v126_v50 = vsub.f32 0.0, %v125_v49 }
 0x238   :  { %v129_v53 = vmul.f32 %v169_v48, %v126_v50 }
 0x239   :  { %v56_v54 = vpop.xlane.xlu0 %55 }
 0x23a   :  { %v130_v55 = vsel %vm122_vm5, %v129_v53, 0.0  ;;  %v59_v56 = vmul.f32 %v171_v51, %v56_v54 }
 0x23c   :  { %v131_v57 = vadd.f32 %v130_v55, %v59_v56 }
 0x23e   :  { %v135_v58 = vsel %vm134_vm6, %v59_v56, %v131_v57 }
 0x23f   :  { %137 = vst.msk [vmem:[#allocation2] sm:$0x1] %vm136_vm7, %v135_v58 }
 0x240   :  { %183 = shalt.err (!%p180_p4)
}
 0x241   :  { %s184_s29 = scalar_lea.hbm %s265_s5, 16 }
 0x242   :  { %p185_p5 = scmp.ne.s32.totalorder %s265_s5, %s184_s29  ;;  %p188_p6 = scmp.lt.u32.totalorder %s184_s29, %s265_s5 }
 0x244   :  { %p190_p7 = pnand %p188_p6, %p185_p5 }
 0x246   :  { %193 = shalt.err (!%p190_p7)
}
 0x247   :  { %147 = dma.vmem_to_hbm [thread:$0]  %s145_s24, 16, %s265_s5, [#allocation3]  }
 0x248   :  { %194 = dma.done.wait [#allocation3], 16  }
 0x249   :  { %195 = vsyncadd [#allocation3], 4294967280 }
 0x24a   :  { %151 = vsyncpa [#allocation3], 1 }

</bundles_post_ra>
